<compile_context>
chip_gen: v7x
topology: tpu7x:2x2x1
jax: 0.10.0
libtpu: 0.0.40
codegen_flags: <defaults>
</compile_context>

<pallas_src>
import functools

import jax
import jax.numpy as jnp
from jax.experimental import pallas as pl
from jax.experimental.pallas import tpu as pltpu


def _round_up(x: int, m: int) -> int:
    return (x + m - 1) // m * m


def _vmem_budget_bytes() -> int:
    """Scoped-VMEM limit: ~3/4 of physical, capped at 64 MiB (safe on v5e/v6e's
    128 MiB and v7x's 64 MiB)."""
    cap = 64 * 1024 * 1024
    try:
        info = pltpu.get_tpu_info()
        cap = int(getattr(info, "vmem_capacity_bytes", cap)) or cap
    except Exception:
        pass
    return min(64 * 1024 * 1024, cap * 3 // 4)


def _tile_and_pad(n: int, unit: int, target: int):
    """Pick (tile, padded): tile a multiple of `unit` and <= target, padded a
    multiple of tile covering n.  Prefers padding only to `unit` granularity;
    accepts a bit more padding only if the divisor-tile would be tiny."""
    target = max(unit, (target // unit) * unit)
    padded = _round_up(n, unit)
    tile = min(target, padded)
    while padded % tile:
        tile -= unit
    if tile * 4 < min(target, padded):
        # Awkward n: take a healthy tile and pay a little extra zero padding.
        tile = min(target, padded)
        padded = _round_up(n, tile)
    return tile, padded


def _pad_cast(x, rows: int, cols: int, dt):
    """Cast/pad only when actually required (avoids an extra HBM pass)."""
    if x.dtype != dt:
        x = x.astype(dt)
    r, c = x.shape
    if (r, c) != (rows, cols):
        x = jnp.pad(x, ((0, rows - r), (0, cols - c)))
    return x


# ---------------- small-problem fast path: everything resident ----------------
def _small_gcn_kernel(a_ref, h_ref, w_ref, o_ref):
    ah = jnp.dot(a_ref[...], h_ref[...], preferred_element_type=jnp.float32)
    o_ref[...] = jnp.dot(
        ah, w_ref[...].astype(jnp.float32), preferred_element_type=jnp.float32
    ).astype(o_ref.dtype)


# ---------------- fused gridded kernel: out = (A @ H) @ W ---------------------
def _fused_gcn_kernel(a_ref, h_ref, w_ref, o_ref, acc_ref, *, tk, h_resident):
    k = pl.program_id(1)

    @pl.when(k == 0)
    def _():
        acc_ref[...] = jnp.zeros_like(acc_ref)

    if h_resident:
        # H is fully resident in VMEM (constant block index); slice the k-tile.
        off = pl.multiple_of(k * tk, tk)
        h_blk = h_ref[pl.ds(off, tk), :]
    else:
        h_blk = h_ref[...]

    acc_ref[...] += jnp.dot(a_ref[...], h_blk, preferred_element_type=jnp.float32)

    @pl.when(k == pl.num_programs(1) - 1)
    def _():
        # Final tiny matmul by W, done in f32 to avoid re-rounding A@H.
        o_ref[...] = jnp.dot(
            acc_ref[...],
            w_ref[...].astype(jnp.float32),
            preferred_element_type=jnp.float32,
        ).astype(o_ref.dtype)


def gcn_layer(
    A,
    H,
    W,
    *,
    compute_dtype=jnp.bfloat16,
    tm_target: int = 512,
    tk_target: int = 1024,
    allow_fast_path: bool = True,
):
    """Pallas equivalent of GCNLayer.forward(A, H, W) = A @ (H @ W)."""
    N, D = H.shape
    assert A.shape == (N, N)
    assert W.shape == (D, D)
    out_dtype = H.dtype
    cdt = jnp.dtype(compute_dtype) if compute_dtype is not None else jnp.dtype(H.dtype)
    isz = cdt.itemsize
    out_isz = jnp.dtype(out_dtype).itemsize

    vmem_limit = _vmem_budget_bytes()

    # ---------------- small-problem fast path ----------------
    small_bytes = (N * N + 2 * N * D + D * D) * isz + 2 * N * D * 4
    if allow_fast_path and small_bytes <= vmem_limit // 2:
        A_c = A if A.dtype == cdt else A.astype(cdt)
        H_c = H if H.dtype == cdt else H.astype(cdt)
        W_c = W if W.dtype == cdt else W.astype(cdt)
        return pl.pallas_call(
            _small_gcn_kernel,
            out_shape=jax.ShapeDtypeStruct((N, D), out_dtype),
            compiler_params=pltpu.CompilerParams(vmem_limit_bytes=vmem_limit),
        )(A_c, H_c, W_c)

    # ---------------- fused gridded path ----------------
    Dp = _round_up(D, 128)  # lane-dense output width
    budget = max(vmem_limit - (4 << 20), 4 << 20)  # leave headroom for Mosaic

    Nr8 = _round_up(N, 8)
    # v7x megacore: keep >= 2 row tiles so both TensorCores get work.
    tm_cap = max(8, min(tm_target, (Nr8 // 2) // 8 * 8)) if Nr8 >= 16 else 8

    def footprint(tm, tk, nk, h_res):
        b = 2 * tm * tk * isz            # A tile, double-buffered
        b += 2 * Dp * Dp * isz           # W (resident; allocator still 2-bufs)
        b += 2 * tm * Dp * out_isz       # output tile
        b += tm * Dp * 4                 # f32 accumulator scratch
        b += 2 * (nk if h_res else tk) * Dp * isz  # H (resident or tiled)
        return b

    tm_t, tk_t = tm_target, tk_target
    while True:
        tm, Nr = _tile_and_pad(N, 8, min(tm_t, tm_cap))
        tk, Nk = _tile_and_pad(N, 128, tk_t)
        h_resident = 2 * Nk * Dp * isz <= budget // 3
        if footprint(tm, tk, Nk, h_resident) <= budget or (tm_t <= 8 and tk_t <= 128):
            break
        if tk_t > 128:
            tk_t //= 2
        else:
            tm_t //= 2

    A_p = _pad_cast(A, Nr, Nk, cdt)
    H_p = _pad_cast(H, Nk, Dp, cdt)
    W_p = _pad_cast(W, Dp, Dp, cdt)

    n_row_tiles = Nr // tm
    n_k_tiles = Nk // tk

    if h_resident:
        h_spec = pl.BlockSpec((Nk, Dp), lambda i, k: (0, 0))
        h_bytes = Nk * Dp
    else:
        h_spec = pl.BlockSpec((tk, Dp), lambda i, k: (k, 0))
        h_bytes = n_row_tiles * Nk * Dp

    kernel = functools.partial(_fused_gcn_kernel, tk=tk, h_resident=h_resident)

    out_p = pl.pallas_call(
        kernel,
        out_shape=jax.ShapeDtypeStruct((Nr, Dp), out_dtype),
        grid_spec=pltpu.PrefetchScalarGridSpec(
            num_scalar_prefetch=0,
            grid=(n_row_tiles, n_k_tiles),
            in_specs=[
                pl.BlockSpec((tm, tk), lambda i, k: (i, k)),   # A, streamed
                h_spec,                                         # H
                pl.BlockSpec((Dp, Dp), lambda i, k: (0, 0)),    # W, resident
            ],
            out_specs=pl.BlockSpec((tm, Dp), lambda i, k: (i, 0)),
            scratch_shapes=[pltpu.VMEM((tm, Dp), jnp.float32)],
        ),
        compiler_params=pltpu.CompilerParams(
            dimension_semantics=("parallel", "arbitrary"),
            vmem_limit_bytes=vmem_limit,
        ),
        cost_estimate=pl.CostEstimate(
            flops=2 * Nr * Nk * Dp + 2 * Nr * Dp * Dp,
            bytes_accessed=(Nr * Nk + h_bytes + Dp * Dp) * isz
            + Nr * Dp * out_isz,
            transcendentals=0,
        ),
    )(A_p, H_p, W_p)

    if Nr == N and Dp == D:
        return out_p
    return out_p[:N, :D]


if __name__ == "__main__":
    num_vertices = 8
    hidden_dim = 32

    key = jax.random.PRNGKey(0)
    k_a, k_h, k_w = jax.random.split(key, 3)

    # Deterministic synthetic inputs (GCNLayer itself has no parameters).
    A_raw = jax.random.uniform(k_a, (num_vertices, num_vertices), jnp.float32)
    A_sym = 0.5 * (A_raw + A_raw.T) + jnp.eye(num_vertices, dtype=jnp.float32)
    A = A_sym / jnp.sum(A_sym, axis=1, keepdims=True)

    H = jax.random.normal(k_h, (num_vertices, hidden_dim), jnp.float32)
    W = jax.random.normal(k_w, (hidden_dim, hidden_dim), jnp.float32)

    ref = A @ (H @ W)

    # Default path (bf16 compute, f32 accumulation) -> small-problem fast path.
    out = gcn_layer(A, H, W)
    jax.block_until_ready(out)
    assert out.shape == (num_vertices, hidden_dim)
    assert jnp.allclose(out, ref, atol=1e-1, rtol=5e-2)

    # f32 compute path -> tight tolerance.
    out_f32 = gcn_layer(A, H, W, compute_dtype=jnp.float32)
    jax.block_until_ready(out_f32)
    assert jnp.allclose(out_f32, ref, atol=1e-4, rtol=1e-4)

    # Exercise the fused, gridded path (padding + resident H + accumulator) on
    # a larger, non-128-aligned problem.
    N2, D2 = 200, 64
    k_a2, k_h2, k_w2 = jax.random.split(jax.random.PRNGKey(1), 3)
    A2_raw = jax.random.uniform(k_a2, (N2, N2), jnp.float32)
    A2_sym = 0.5 * (A2_raw + A2_raw.T) + jnp.eye(N2, dtype=jnp.float32)
    A2 = A2_sym / jnp.sum(A2_sym, axis=1, keepdims=True)
    H2 = jax.random.normal(k_h2, (N2, D2), jnp.float32)
    W2 = jax.random.normal(k_w2, (D2, D2), jnp.float32)
    ref2 = A2 @ (H2 @ W2)

    out2 = gcn_layer(A2, H2, W2, compute_dtype=jnp.float32, allow_fast_path=False)
    jax.block_until_ready(out2)
    assert out2.shape == (N2, D2)
    assert jnp.allclose(out2, ref2, atol=1e-3, rtol=1e-3)

    print("KERNEL_OK")
</pallas_src>

<mosaic_0001>
module attributes {stable_mosaic.version = 11 : i64} {
  func.func @_small_gcn_kernel(%arg0: memref<8x8xbf16, #tpu.memory_space<vmem>>, %arg1: memref<8x32xbf16, #tpu.memory_space<vmem>>, %arg2: memref<32x32xbf16, #tpu.memory_space<vmem>>, %arg3: memref<8x32xf32, #tpu.memory_space<vmem>>) attributes {dimension_semantics = [], scalar_prefetch = 0 : i64, scratch_operands = 0 : i64, tpu.core_type = #tpu.core_type<tc>} {
    %c0 = arith.constant 0 : index
    %c0_0 = arith.constant 0 : index
    %0 = vector.load %arg0[%c0, %c0_0] : memref<8x8xbf16, #tpu.memory_space<vmem>>, vector<8x8xbf16>
    %c0_1 = arith.constant 0 : index
    %c0_2 = arith.constant 0 : index
    %1 = vector.load %arg1[%c0_1, %c0_2] : memref<8x32xbf16, #tpu.memory_space<vmem>>, vector<8x32xbf16>
    %cst = arith.constant dense<0.000000e+00> : vector<8x32xf32>
    %2 = tpu.matmul %0, %1, %cst {dimension_numbers = #tpu.dot_dimension_numbers<[1], [0], [0], [1], [0, 0, 1, 1], [], []>} : vector<8x8xbf16>, vector<8x32xbf16>, vector<8x32xf32> -> vector<8x32xf32>
    %c0_3 = arith.constant 0 : index
    %c0_4 = arith.constant 0 : index
    %3 = vector.load %arg2[%c0_3, %c0_4] : memref<32x32xbf16, #tpu.memory_space<vmem>>, vector<32x32xbf16>
    %4 = arith.extf %3 : vector<32x32xbf16> to vector<32x32xf32>
    %cst_5 = arith.constant dense<0.000000e+00> : vector<8x32xf32>
    %5 = tpu.matmul %2, %4, %cst_5 {dimension_numbers = #tpu.dot_dimension_numbers<[1], [0], [0], [1], [0, 0, 1, 1], [], []>} : vector<8x32xf32>, vector<32x32xf32>, vector<8x32xf32> -> vector<8x32xf32>
    %c0_6 = arith.constant 0 : index
    %c0_7 = arith.constant 0 : index
    %6 = vector.load %arg3[%c0_6, %c0_7] : memref<8x32xf32, #tpu.memory_space<vmem>>, vector<8x32xf32>
    tpu.vector_store %arg3[%c0_6, %c0_7], %5 {strides = array<i32>} : memref<8x32xf32, #tpu.memory_space<vmem>>, vector<8x32xf32>,
    return
  }
}

</mosaic_0001>

<bundles_post_ra>
// kernel: tpu_custom_call.1
= control target key start
LH: loop header
LB: loop body
LE: loop exit
PB: predicated region body
PF: predicated region fallthrough
CT: control target
= control target key end

     0   :  { %8 = vsyncpa [#allocation3], 0  ;;  %s423_s0 = inlined_call_operand.hbm [shape: bf16[8,8], index: 0, kind: input, shape index: {}]   ;;  %s424_s1 = inlined_call_operand.hbm [shape: bf16[8,32], index: 1, kind: input, shape index: {}]   ;;  %s425_s2 = inlined_call_operand.hbm [shape: bf16[32,32], index: 2, kind: input, shape index: {}]   ;;  %s426_s3 = inlined_call_operand.hbm [shape: f32[8,32], index: 3, kind: output, shape index: {}]  }
   0x1   :  { %9 = vsyncpa [#allocation6], 0 }
   0x2   :  { %10 = vsyncpa [#allocation4], 0  ;;  %s346_s12 = smov [#allocation5]   ;;  %s347_s14 = smov [#allocation2]  }
   0x3   :  { %s27_s13 = sshll.u32 %s346_s12, 4  ;;  %s17_s15 = sshll.u32 %s347_s14, 4  ;;  %s28_s13 = int_to_ptr.vmem [resolvable:$true] %s27_s13  ;;  %s18_s15 = int_to_ptr.vmem [resolvable:$true] %s17_s15 }
   0x4   :  { %s252_s18 = scalar_lea.hbm %s424_s1, 64 }
   0x5   :  { %p253_p0 = scmp.ne.s32.totalorder %s424_s1, %s252_s18  ;;  %p256_p1 = scmp.lt.u32.totalorder %s252_s18, %s424_s1 }
   0x7   :  { %p258_p2 = pnand %p256_p1, %p253_p0 }
   0x9   :  { %261 = shalt.err (!%p258_p2)
}
   0xa   :  { %s262_s23 = scalar_lea.vmem %s28_s13, 64  ;;  %p267_p4 = scmp.lt.s32.totalorder %s28_s13, %s28_s13 }
   0xb   :  { %p263_p3 = scmp.ne.s32.totalorder %s28_s13, %s262_s23  ;;  %p268_p5 = scmp.lt.s32.totalorder %s262_s23, %s262_s23 }
   0xd   :  { %p269_p6 = por %p268_p5, %p267_p4 }
   0xf   :  { %p270_p7 = pnand %p269_p6, %p263_p3 }
  0x11   :  { %273 = shalt.err (!%p270_p7)
}
  0x12   :  { %30 = dma.hbm_to_vmem [thread:$0]  %s424_s1, 64, %s28_s13, [#allocation6]  }
  0x13   :  { %s274_s28 = scalar_lea.hbm %s423_s0, 64 }
  0x14   :  { %p275_p8 = scmp.ne.s32.totalorder %s423_s0, %s274_s28  ;;  %p278_p9 = scmp.lt.u32.totalorder %s274_s28, %s423_s0 }
  0x16   :  { %p280_p10 = pnand %p278_p9, %p275_p8 }
  0x18   :  { %283 = shalt.err (!%p280_p10)
}
  0x19   :  { %s284_s6 = scalar_lea.vmem %s18_s15, 64  ;;  %p289_p12 = scmp.lt.s32.totalorder %s18_s15, %s18_s15 }
  0x1a   :  { %p285_p11 = scmp.ne.s32.totalorder %s18_s15, %s284_s6  ;;  %p290_p13 = scmp.lt.s32.totalorder %s284_s6, %s284_s6 }
  0x1c   :  { %p291_p0 = por %p290_p13, %p289_p12 }
  0x1e   :  { %p292_p1 = pnand %p291_p0, %p285_p11 }
  0x20   :  { %295 = shalt.err (!%p292_p1)
}
  0x21   :  { %20 = dma.hbm_to_vmem [thread:$0]  %s423_s0, 64, %s18_s15, [#allocation3]  }
  0x22   :  { %s348_s8 = smov [#allocation7]   ;;  %s296_s12 = scalar_lea.hbm %s425_s2, 256 }
  0x23   :  { %s36_s9 = sshll.u32 %s348_s8, 4  ;;  %p297_p2 = scmp.ne.s32.totalorder %s425_s2, %s296_s12  ;;  %s37_s9 = int_to_ptr.vmem [resolvable:$true] %s36_s9 }
  0x24   :  { %p300_p3 = scmp.lt.u32.totalorder %s296_s12, %s425_s2 }
  0x26   :  { %p302_p4 = pnand %p300_p3, %p297_p2 }
  0x28   :  { %305 = shalt.err (!%p302_p4)
}
  0x29   :  { %s306_s18 = scalar_lea.vmem %s37_s9, 256  ;;  %p311_p6 = scmp.lt.s32.totalorder %s37_s9, %s37_s9 }
  0x2a   :  { %p307_p5 = scmp.ne.s32.totalorder %s37_s9, %s306_s18  ;;  %p312_p7 = scmp.lt.s32.totalorder %s306_s18, %s306_s18 }
  0x2c   :  { %p313_p8 = por %p312_p7, %p311_p6 }
  0x2e   :  { %p314_p9 = pnand %p313_p8, %p307_p5 }
  0x30   :  { %317 = shalt.err (!%p314_p9)
}
  0x31   :  { %s349_s0 = smov 64   ;;  %s350_s15 = smov 4  }
  0x32   :  { %42 = dma.hbm_to_vmem [thread:$0]  %s425_s2, 256, %s37_s9, [#allocation6], %s349_s0, %s349_s0, %s350_s15  }
  0x33   :  { %340 = dma.done.wait [#allocation3], 64  }
  0x34   :  { %341 = vsyncadd [#allocation3], 4294967232 }
  0x35   :  { %342 = dma.done.wait [#allocation6], 320  }
  0x36   :  { %343 = vsyncadd [#allocation6], 4294966976  ;;  %v351_v0 = vmov 0.0   ;;  %vm352_vm0 = vmmov 0   ;;  %v353_v1 = vmov 0.0|0.0   ;;  %vm59_vm1 = vcmask 1043456  }
  0x37   :  { %220 = vmatprep.subr.bf16.mxu0 %v351_v0  ;;  %222 = vmatprep.mubr.msk.bf16.mxu0 %vm352_vm0, %v351_v0  ;;  %v54_v2 = vld [vmem:[#allocation5] sm:$0xf]  ;;  %v205_v3 = vld [vmem:[#allocation7] sm:$0xff]   ;;  %v53_v5 = vld [vmem:[#allocation2] sm:$0xf]  ;;  %vm55_vm2 = vcmask 64512  }
  0x38   :  { %237 = vmatprep.subr.bf16.mxu1 %v353_v1  ;;  %234 = vmatprep.mubr.msk.f32.mxu1 %vm352_vm0, %v351_v0  ;;  %v61_v4 = vsel %vm59_vm1, %v54_v2, 0  ;;  %v212_v6 = vld [vmem:[#allocation7 + $0x8] sm:$0xff]   ;;  %vm111_vm3 = vcmask 261120   ;;  %s354_s2 = smov [#allocation8]  }
  0x39   :  { %239 = vmatpush3.bf16.msra.mxu1 %v205_v3  ;;  %221 = vmatpush3.bf16.msra.mxu0 %v61_v4  ;;  %s192_s21 = sshll.u32 %s354_s2, 4  ;;  %s193_s21 = int_to_ptr.vmem [resolvable:$true] %s192_s21 }
  0x3a   :  { %240 = vmatprep.subr.bf16.mxu1 %v353_v1  ;;  %s318_s22 = scalar_lea.vmem %s193_s21, 128  ;;  %p323_p11 = scmp.lt.s32.totalorder %s193_s21, %s193_s21 }
  0x3b   :  { %p319_p10 = scmp.ne.s32.totalorder %s193_s21, %s318_s22  ;;  %p324_p12 = scmp.lt.s32.totalorder %s318_s22, %s318_s22 }
  0x3c   :  { %223 = vmatmul.mubr.msk.bf16.vlgmr.msra.gmra.mrb[0].mxu0 %vm55_vm2, %v53_v5 }
  0x3d   :  { %242 = vmatpush3.bf16.msra.mxu1 %v212_v6  ;;  %p325_p13 = por %p324_p12, %p323_p11 }
  0x3f   :  { %p326_p0 = pnand %p325_p13, %p319_p10 }
 0x10f   :  { %v97_v7 = vpop.f32.mrb[0].mxu0 }
 0x110   :  { %v224_v8 = vpop.f32.mrb[1].mxu0  ;;  %235 = vmatmul.mubr.msk.f32.vlgmr.msra.gmra.mrb[0].mxu1 %vm111_vm3, %v97_v7 }
 0x111   :  { %v100_v9 = vpop.f32.mrb[2].mxu0 }
 0x112   :  { %v225_v10 = vpop.f32.mrb[3].mxu0 }
 0x1e3   :  { %v181_v11 = vpop.f32.mrb[0].mxu1 }
 0x1e4   :  { %185 = vst.msk [vmem:[#allocation8] sm:$0xff] %vm111_vm3, %v181_v11  ;;  %v236_v12 = vpop.f32.mrb[1].mxu1 }
 0x1e5   :  { %329 = shalt.err (!%p326_p0)
}
 0x1e6   :  { %s330_s25 = scalar_lea.hbm %s426_s3, 128 }
 0x1e7   :  { %p331_p1 = scmp.ne.s32.totalorder %s426_s3, %s330_s25  ;;  %p334_p2 = scmp.lt.u32.totalorder %s330_s25, %s426_s3 }
 0x1e9   :  { %p336_p3 = pnand %p334_p2, %p331_p1 }
 0x1eb   :  { %339 = shalt.err (!%p336_p3)
}
 0x1ec   :  { %195 = dma.vmem_to_hbm [thread:$0]  %s193_s21, 128, %s426_s3, [#allocation4]  }
 0x1ed   :  { %344 = dma.done.wait [#allocation4], 128  }
 0x1ee   :  { %345 = vsyncadd [#allocation4], 4294967168 }
 0x1ef   :  { %199 = vsyncpa [#allocation3], 1 }
 0x1f0   :  { %200 = vsyncpa [#allocation6], 1 }
 0x1f1   :  { %201 = vsyncpa [#allocation4], 1 }

</bundles_post_ra>
